<compile_context>
chip_gen: v7x
topology: tpu7x:2x2x1
jax: 0.10.0
libtpu: 0.0.40
codegen_flags: <defaults>
</compile_context>

<pallas_src>
import jax
import jax.numpy as jnp
import numpy as np
from jax.experimental import pallas as pl
from jax.experimental.pallas import tpu as pltpu
from functools import partial

BN_EPS = 1e-5      # PyTorch BatchNorm1d default eps
NORM_EPS = 1e-12   # guards 0/0 in the final L2-style normalization


# ---------------------------------------------------------------------------
# Fused Pallas kernel: both towers as block-diagonal layers, each layer =
#   [Linear (no bias) -> BatchNorm1d(train-mode stats) -> ReLU -> Dropout(0)]
# followed by per-tower x * rsqrt(sum(x^2, -1)).
# Activations are laid out as [user || item || zero pad] along lanes; pad
# lanes stay exactly zero through every layer (zero weight rows/cols, zero
# beta), so BN column statistics of the real lanes are untouched.
# ---------------------------------------------------------------------------
def _make_dssm_kernel(num_layers, u_out, i_out):
    def kernel(x_ref, w_ref, gb_ref, out_ref):
        h = x_ref[...].astype(jnp.float32)          # (B, D) fused activations
        inv_n = 1.0 / h.shape[0]

        for l in range(num_layers):                 # static unroll (L small)
            # Block-diagonal fused Linear. Bias omitted: it is exactly
            # cancelled by the train-mode BatchNorm mean-subtract below.
            y = jnp.dot(h.astype(jnp.bfloat16), w_ref[l],
                        preferred_element_type=jnp.float32)

            # BatchNorm1d, training-mode batch statistics (biased variance),
            # single fused reduction pass over the batch (sublane) axis.
            # TODO(synk): try routing these two batch-axis reductions through
            # the MXU (ones(1,B,bf16) @ [y || y*y]); keep only if the
            # per-layer critical path measurably shrinks.
            mean = jnp.sum(y, axis=0, keepdims=True) * inv_n
            ex2 = jnp.sum(y * y, axis=0, keepdims=True) * inv_n
            var = jnp.maximum(ex2 - mean * mean, 0.0)

            gb = gb_ref[l]                           # (2, D): gamma row, beta row
            scale = gb[0:1, :] * jax.lax.rsqrt(var + BN_EPS)
            # ReLU; Dropout(p=0.0) is identity.
            h = jnp.maximum((y - mean) * scale + gb[1:2, :], 0.0)

        # Per-tower normalization: x / sqrt(sum(x^2, -1)).
        lane = jax.lax.broadcasted_iota(jnp.int32, h.shape, 1)
        h2 = h * h
        ssq_u = jnp.sum(jnp.where(lane < u_out, h2, 0.0),
                        axis=-1, keepdims=True)
        ssq_i = jnp.sum(h2, axis=-1, keepdims=True) - ssq_u   # pad lanes are 0
        inv = jnp.where(lane < u_out,
                        jax.lax.rsqrt(ssq_u + NORM_EPS),
                        jax.lax.rsqrt(ssq_i + NORM_EPS))
        # Single full-width store of [user || item || zero pad].
        out_ref[...] = h * inv

    return kernel


def dssm_towers_pallas(u_x, i_x, w_slab, gb_slab, u_out, i_out):
    """u_x: (B, user_in) f32; i_x: (B, item_in) f32; slabs from pack_fused_params."""
    B = u_x.shape[0]
    L, D, _ = w_slab.shape
    u_in, i_in = u_x.shape[1], i_x.shape[1]

    # Assemble the fused, lane-padded input [user || item || 0] (cheap XLA glue).
    x = jnp.zeros((B, D), jnp.float32)
    x = x.at[:, :u_in].set(u_x).at[:, u_in:u_in + i_in].set(i_x)

    vmem = pl.BlockSpec(memory_space=pltpu.MemorySpace.VMEM)
    slab = pl.pallas_call(
        _make_dssm_kernel(L, u_out, i_out),
        out_shape=jax.ShapeDtypeStruct((B, D), jnp.float32),
        in_specs=[vmem, vmem, vmem],
        out_specs=vmem,
    )(x, w_slab, gb_slab)
    return slab[:, :u_out], slab[:, u_out:u_out + i_out]


# ---------------------------------------------------------------------------
# Parameter construction (deterministic, PyTorch-default-like init) + packing
# ---------------------------------------------------------------------------
def make_tower_params(key, in_dim, hidden_dims):
    params = []
    d = in_dim
    for h in hidden_dims:
        key, kw = jax.random.split(key)
        bound = 1.0 / np.sqrt(d)
        W = jax.random.uniform(kw, (d, h), jnp.float32, -bound, bound)
        # NOTE: the Linear bias is intentionally not materialized — training-
        # mode BatchNorm subtracts the batch mean right after the Linear,
        # which cancels any constant bias exactly (semantics preserved).
        params.append(dict(
            W=W,                              # (in, out) f32; cast to bf16 in pack
            gamma=np.ones((h,), np.float32),  # BatchNorm1d affine weight
            beta=np.zeros((h,), np.float32),  # BatchNorm1d affine bias
        ))
        d = h
    return params


def pack_fused_params(user_params, item_params):
    """Pack both towers into block-diagonal per-layer weights, stacked into
    one bf16 (L, D, D) weight slab and one f32 (L, 2, D) gamma/beta slab."""
    assert len(user_params) == len(item_params), \
        "block-diagonal tower fusion requires towers of equal depth"
    # TODO(synk): support towers of unequal depth (pad with identity layers).
    L = len(user_params)
    dims = []
    for pu, pi in zip(user_params, item_params):
        ku, nu = pu["W"].shape
        ki, ni = pi["W"].shape
        dims.append((ku, nu, ki, ni))
    D = max(max(ku + ki, nu + ni) for (ku, nu, ki, ni) in dims)
    D = ((D + 7) // 8) * 8   # sublane-friendly; do NOT pad lanes to 128

    W = np.zeros((L, D, D), np.float32)
    GB = np.zeros((L, 2, D), np.float32)
    GB[:, 0, :] = 1.0        # gamma=1 on pad lanes (harmless: columns stay 0)
    for l, ((ku, nu, ki, ni), pu, pi) in enumerate(
            zip(dims, user_params, item_params)):
        W[l, :ku, :nu] = np.asarray(pu["W"], np.float32)
        W[l, ku:ku + ki, nu:nu + ni] = np.asarray(pi["W"], np.float32)
        GB[l, 0, :nu] = pu["gamma"]
        GB[l, 0, nu:nu + ni] = pi["gamma"]
        GB[l, 1, :nu] = pu["beta"]
        GB[l, 1, nu:nu + ni] = pi["beta"]
    return jnp.asarray(W, jnp.bfloat16), jnp.asarray(GB, jnp.float32), D


def make_embedding(key, field_dims, embed_dim):
    table = jax.random.normal(key, (int(sum(field_dims)), embed_dim),
                              jnp.float32)  # nn.Embedding default N(0, 1)
    offsets = jnp.array((0, *np.cumsum(field_dims)[:-1]), dtype=jnp.int32)
    return table, offsets


def embed(feat, table, offsets):
    # feat: (B, num_fields) int32 -> (B, num_fields * embed_dim) f32
    idx = feat + offsets[None, :]
    e = table[idx]                       # gather (glue, plain JAX)
    return e.reshape(feat.shape[0], -1)


# ---------------------------------------------------------------------------
# DSSM forward
# ---------------------------------------------------------------------------
@partial(jax.jit, static_argnames=("u_out", "i_out"))
def dssm_forward(user_feat, item_feat, p, *, u_out, i_out):
    u = embed(user_feat, p["user_emb"], p["user_off"])
    i = embed(item_feat, p["item_emb"], p["item_off"])
    return dssm_towers_pallas(u, i, p["W"], p["GB"], u_out, i_out)


if __name__ == "__main__":
    # Small config consistent with the module
    field_dim_user = (10, 20, 30)     # 3 user fields
    field_dim_item = (15, 25)         # 2 item fields
    embed_dim = 8
    user_dnn_size = (32, 32, 16)
    item_dnn_size = (32, 32, 16)
    B = 8

    key = jax.random.PRNGKey(0)
    k_ue, k_ie, k_ut, k_it, k_uf, k_if = jax.random.split(key, 6)

    user_emb, user_off = make_embedding(k_ue, field_dim_user, embed_dim)
    item_emb, item_off = make_embedding(k_ie, field_dim_item, embed_dim)
    user_tower = make_tower_params(k_ut, len(field_dim_user) * embed_dim,
                                   user_dnn_size)
    item_tower = make_tower_params(k_it, len(field_dim_item) * embed_dim,
                                   item_dnn_size)
    W_slab, GB_slab, _ = pack_fused_params(user_tower, item_tower)

    params = dict(
        user_emb=user_emb, user_off=user_off,
        item_emb=item_emb, item_off=item_off,
        W=W_slab, GB=GB_slab,
    )

    user_feat = jax.random.randint(
        k_uf, (B, len(field_dim_user)), 0,
        jnp.array(field_dim_user, dtype=jnp.int32), dtype=jnp.int32)
    item_feat = jax.random.randint(
        k_if, (B, len(field_dim_item)), 0,
        jnp.array(field_dim_item, dtype=jnp.int32), dtype=jnp.int32)

    u_vec, i_vec = dssm_forward(user_feat, item_feat, params,
                                u_out=user_dnn_size[-1],
                                i_out=item_dnn_size[-1])
    u_vec = jax.block_until_ready(u_vec)
    i_vec = jax.block_until_ready(i_vec)

    assert u_vec.shape == (B, user_dnn_size[-1])
    assert i_vec.shape == (B, item_dnn_size[-1])
    assert bool(jnp.all(jnp.isfinite(u_vec))) and bool(jnp.all(jnp.isfinite(i_vec)))
    # rows should be unit-norm after the final normalization
    assert bool(jnp.allclose(jnp.sum(u_vec ** 2, axis=-1), 1.0, atol=1e-4))
    assert bool(jnp.allclose(jnp.sum(i_vec ** 2, axis=-1), 1.0, atol=1e-4))

    print("KERNEL_OK")
</pallas_src>

<mosaic_0001>
module attributes {stable_mosaic.version = 11 : i64} {
  func.func @kernel(%arg0: memref<8x64xf32, #tpu.memory_space<vmem>>, %arg1: memref<3x64x64xbf16, #tpu.memory_space<vmem>>, %arg2: memref<3x2x64xf32, #tpu.memory_space<vmem>>, %arg3: memref<8x64xf32, #tpu.memory_space<vmem>>) attributes {dimension_semantics = [], scalar_prefetch = 0 : i64, scratch_operands = 0 : i64, tpu.core_type = #tpu.core_type<tc>} {
    %c0 = arith.constant 0 : index
    %c0_0 = arith.constant 0 : index
    %0 = vector.load %arg0[%c0, %c0_0] : memref<8x64xf32, #tpu.memory_space<vmem>>, vector<8x64xf32>
    %1 = arith.truncf %0 : vector<8x64xf32> to vector<8x64xbf16>
    %c0_1 = arith.constant 0 : index
    %c0_2 = arith.constant 0 : index
    %c0_3 = arith.constant 0 : index
    %2 = vector.load %arg1[%c0_1, %c0_2, %c0_3] : memref<3x64x64xbf16, #tpu.memory_space<vmem>>, vector<1x64x64xbf16>
    %3 = vector.shape_cast %2 : vector<1x64x64xbf16> to vector<64x64xbf16>
    %cst = arith.constant dense<0.000000e+00> : vector<8x64xf32>
    %4 = tpu.matmul %1, %3, %cst {dimension_numbers = #tpu.dot_dimension_numbers<[1], [0], [0], [1], [0, 0, 1, 1], [], []>} : vector<8x64xbf16>, vector<64x64xbf16>, vector<8x64xf32> -> vector<8x64xf32>
    %cst_4 = arith.constant dense<0.000000e+00> : vector<64xf32>
    %5 = vector.multi_reduction <add>, %4, %cst_4 [0] : vector<8x64xf32> to vector<64xf32>
    %6 = vector.shape_cast %5 : vector<64xf32> to vector<1x64xf32>
    %cst_5 = arith.constant 1.250000e-01 : f32
    %7 = vector.broadcast %cst_5 : f32 to vector<1x64xf32>
    %8 = arith.mulf %6, %7 : vector<1x64xf32>
    %9 = arith.mulf %4, %4 : vector<8x64xf32>
    %cst_6 = arith.constant dense<0.000000e+00> : vector<64xf32>
    %10 = vector.multi_reduction <add>, %9, %cst_6 [0] : vector<8x64xf32> to vector<64xf32>
    %11 = vector.shape_cast %10 : vector<64xf32> to vector<1x64xf32>
    %cst_7 = arith.constant 1.250000e-01 : f32
    %12 = vector.broadcast %cst_7 : f32 to vector<1x64xf32>
    %13 = arith.mulf %11, %12 : vector<1x64xf32>
    %14 = arith.mulf %8, %8 : vector<1x64xf32>
    %15 = arith.subf %13, %14 : vector<1x64xf32>
    %cst_8 = arith.constant 0.000000e+00 : f32
    %16 = vector.broadcast %cst_8 : f32 to vector<1x64xf32>
    %17 = arith.maximumf %15, %16 : vector<1x64xf32>
    %c0_9 = arith.constant 0 : index
    %c0_10 = arith.constant 0 : index
    %c0_11 = arith.constant 0 : index
    %18 = vector.load %arg2[%c0_9, %c0_10, %c0_11] : memref<3x2x64xf32, #tpu.memory_space<vmem>>, vector<1x2x64xf32>
    %19 = vector.shape_cast %18 : vector<1x2x64xf32> to vector<2x64xf32>
    %20 = vector.extract_strided_slice %19 {offsets = [0, 0], sizes = [1, 64], strides = [1, 1]} : vector<2x64xf32> to vector<1x64xf32>
    %cst_12 = arith.constant 9.99999974E-6 : f32
    %21 = vector.broadcast %cst_12 : f32 to vector<1x64xf32>
    %22 = arith.addf %17, %21 : vector<1x64xf32>
    %23 = math.rsqrt %22 : vector<1x64xf32>
    %24 = arith.mulf %20, %23 : vector<1x64xf32>
    %25 = vector.broadcast %8 : vector<1x64xf32> to vector<8x64xf32>
    %26 = arith.subf %4, %25 : vector<8x64xf32>
    %27 = vector.broadcast %24 : vector<1x64xf32> to vector<8x64xf32>
    %28 = arith.mulf %26, %27 : vector<8x64xf32>
    %29 = vector.extract_strided_slice %19 {offsets = [1, 0], sizes = [1, 64], strides = [1, 1]} : vector<2x64xf32> to vector<1x64xf32>
    %30 = vector.broadcast %29 : vector<1x64xf32> to vector<8x64xf32>
    %31 = arith.addf %28, %30 : vector<8x64xf32>
    %cst_13 = arith.constant 0.000000e+00 : f32
    %32 = vector.broadcast %cst_13 : f32 to vector<8x64xf32>
    %33 = arith.maximumf %31, %32 : vector<8x64xf32>
    %34 = arith.truncf %33 : vector<8x64xf32> to vector<8x64xbf16>
    %c1 = arith.constant 1 : index
    %c0_14 = arith.constant 0 : index
    %c0_15 = arith.constant 0 : index
    %35 = vector.load %arg1[%c1, %c0_14, %c0_15] : memref<3x64x64xbf16, #tpu.memory_space<vmem>>, vector<1x64x64xbf16>
    %36 = vector.shape_cast %35 : vector<1x64x64xbf16> to vector<64x64xbf16>
    %cst_16 = arith.constant dense<0.000000e+00> : vector<8x64xf32>
    %37 = tpu.matmul %34, %36, %cst_16 {dimension_numbers = #tpu.dot_dimension_numbers<[1], [0], [0], [1], [0, 0, 1, 1], [], []>} : vector<8x64xbf16>, vector<64x64xbf16>, vector<8x64xf32> -> vector<8x64xf32>
    %cst_17 = arith.constant dense<0.000000e+00> : vector<64xf32>
    %38 = vector.multi_reduction <add>, %37, %cst_17 [0] : vector<8x64xf32> to vector<64xf32>
    %39 = vector.shape_cast %38 : vector<64xf32> to vector<1x64xf32>
    %cst_18 = arith.constant 1.250000e-01 : f32
    %40 = vector.broadcast %cst_18 : f32 to vector<1x64xf32>
    %41 = arith.mulf %39, %40 : vector<1x64xf32>
    %42 = arith.mulf %37, %37 : vector<8x64xf32>
    %cst_19 = arith.constant dense<0.000000e+00> : vector<64xf32>
    %43 = vector.multi_reduction <add>, %42, %cst_19 [0] : vector<8x64xf32> to vector<64xf32>
    %44 = vector.shape_cast %43 : vector<64xf32> to vector<1x64xf32>
    %cst_20 = arith.constant 1.250000e-01 : f32
    %45 = vector.broadcast %cst_20 : f32 to vector<1x64xf32>
    %46 = arith.mulf %44, %45 : vector<1x64xf32>
    %47 = arith.mulf %41, %41 : vector<1x64xf32>
    %48 = arith.subf %46, %47 : vector<1x64xf32>
    %cst_21 = arith.constant 0.000000e+00 : f32
    %49 = vector.broadcast %cst_21 : f32 to vector<1x64xf32>
    %50 = arith.maximumf %48, %49 : vector<1x64xf32>
    %c1_22 = arith.constant 1 : index
    %c0_23 = arith.constant 0 : index
    %c0_24 = arith.constant 0 : index
    %51 = vector.load %arg2[%c1_22, %c0_23, %c0_24] : memref<3x2x64xf32, #tpu.memory_space<vmem>>, vector<1x2x64xf32>
    %52 = vector.shape_cast %51 : vector<1x2x64xf32> to vector<2x64xf32>
    %53 = vector.extract_strided_slice %52 {offsets = [0, 0], sizes = [1, 64], strides = [1, 1]} : vector<2x64xf32> to vector<1x64xf32>
    %cst_25 = arith.constant 9.99999974E-6 : f32
    %54 = vector.broadcast %cst_25 : f32 to vector<1x64xf32>
    %55 = arith.addf %50, %54 : vector<1x64xf32>
    %56 = math.rsqrt %55 : vector<1x64xf32>
    %57 = arith.mulf %53, %56 : vector<1x64xf32>
    %58 = vector.broadcast %41 : vector<1x64xf32> to vector<8x64xf32>
    %59 = arith.subf %37, %58 : vector<8x64xf32>
    %60 = vector.broadcast %57 : vector<1x64xf32> to vector<8x64xf32>
    %61 = arith.mulf %59, %60 : vector<8x64xf32>
    %62 = vector.extract_strided_slice %52 {offsets = [1, 0], sizes = [1, 64], strides = [1, 1]} : vector<2x64xf32> to vector<1x64xf32>
    %63 = vector.broadcast %62 : vector<1x64xf32> to vector<8x64xf32>
    %64 = arith.addf %61, %63 : vector<8x64xf32>
    %cst_26 = arith.constant 0.000000e+00 : f32
    %65 = vector.broadcast %cst_26 : f32 to vector<8x64xf32>
    %66 = arith.maximumf %64, %65 : vector<8x64xf32>
    %67 = arith.truncf %66 : vector<8x64xf32> to vector<8x64xbf16>
    %c2 = arith.constant 2 : index
    %c0_27 = arith.constant 0 : index
    %c0_28 = arith.constant 0 : index
    %68 = vector.load %arg1[%c2, %c0_27, %c0_28] : memref<3x64x64xbf16, #tpu.memory_space<vmem>>, vector<1x64x64xbf16>
    %69 = vector.shape_cast %68 : vector<1x64x64xbf16> to vector<64x64xbf16>
    %cst_29 = arith.constant dense<0.000000e+00> : vector<8x64xf32>
    %70 = tpu.matmul %67, %69, %cst_29 {dimension_numbers = #tpu.dot_dimension_numbers<[1], [0], [0], [1], [0, 0, 1, 1], [], []>} : vector<8x64xbf16>, vector<64x64xbf16>, vector<8x64xf32> -> vector<8x64xf32>
    %cst_30 = arith.constant dense<0.000000e+00> : vector<64xf32>
    %71 = vector.multi_reduction <add>, %70, %cst_30 [0] : vector<8x64xf32> to vector<64xf32>
    %72 = vector.shape_cast %71 : vector<64xf32> to vector<1x64xf32>
    %cst_31 = arith.constant 1.250000e-01 : f32
    %73 = vector.broadcast %cst_31 : f32 to vector<1x64xf32>
    %74 = arith.mulf %72, %73 : vector<1x64xf32>
    %75 = arith.mulf %70, %70 : vector<8x64xf32>
    %cst_32 = arith.constant dense<0.000000e+00> : vector<64xf32>
    %76 = vector.multi_reduction <add>, %75, %cst_32 [0] : vector<8x64xf32> to vector<64xf32>
    %77 = vector.shape_cast %76 : vector<64xf32> to vector<1x64xf32>
    %cst_33 = arith.constant 1.250000e-01 : f32
    %78 = vector.broadcast %cst_33 : f32 to vector<1x64xf32>
    %79 = arith.mulf %77, %78 : vector<1x64xf32>
    %80 = arith.mulf %74, %74 : vector<1x64xf32>
    %81 = arith.subf %79, %80 : vector<1x64xf32>
    %cst_34 = arith.constant 0.000000e+00 : f32
    %82 = vector.broadcast %cst_34 : f32 to vector<1x64xf32>
    %83 = arith.maximumf %81, %82 : vector<1x64xf32>
    %c2_35 = arith.constant 2 : index
    %c0_36 = arith.constant 0 : index
    %c0_37 = arith.constant 0 : index
    %84 = vector.load %arg2[%c2_35, %c0_36, %c0_37] : memref<3x2x64xf32, #tpu.memory_space<vmem>>, vector<1x2x64xf32>
    %85 = vector.shape_cast %84 : vector<1x2x64xf32> to vector<2x64xf32>
    %86 = vector.extract_strided_slice %85 {offsets = [0, 0], sizes = [1, 64], strides = [1, 1]} : vector<2x64xf32> to vector<1x64xf32>
    %cst_38 = arith.constant 9.99999974E-6 : f32
    %87 = vector.broadcast %cst_38 : f32 to vector<1x64xf32>
    %88 = arith.addf %83, %87 : vector<1x64xf32>
    %89 = math.rsqrt %88 : vector<1x64xf32>
    %90 = arith.mulf %86, %89 : vector<1x64xf32>
    %91 = vector.broadcast %74 : vector<1x64xf32> to vector<8x64xf32>
    %92 = arith.subf %70, %91 : vector<8x64xf32>
    %93 = vector.broadcast %90 : vector<1x64xf32> to vector<8x64xf32>
    %94 = arith.mulf %92, %93 : vector<8x64xf32>
    %95 = vector.extract_strided_slice %85 {offsets = [1, 0], sizes = [1, 64], strides = [1, 1]} : vector<2x64xf32> to vector<1x64xf32>
    %96 = vector.broadcast %95 : vector<1x64xf32> to vector<8x64xf32>
    %97 = arith.addf %94, %96 : vector<8x64xf32>
    %cst_39 = arith.constant 0.000000e+00 : f32
    %98 = vector.broadcast %cst_39 : f32 to vector<8x64xf32>
    %99 = arith.maximumf %97, %98 : vector<8x64xf32>
    %100 = tpu.iota {dimensions = array<i32: 1>} : vector<8x64xi32>
    %101 = arith.mulf %99, %99 : vector<8x64xf32>
    %c16_i32 = arith.constant 16 : i32
    %102 = vector.broadcast %c16_i32 : i32 to vector<8x64xi32>
    %103 = arith.cmpi slt, %100, %102 : vector<8x64xi32>
    %cst_40 = arith.constant 0.000000e+00 : f32
    %104 = vector.broadcast %cst_40 : f32 to vector<8x64xf32>
    %105 = arith.select %103, %101, %104 : vector<8x64xi1>, vector<8x64xf32>
    %cst_41 = arith.constant dense<0.000000e+00> : vector<8xf32>
    %106 = vector.multi_reduction <add>, %105, %cst_41 [1] : vector<8x64xf32> to vector<8xf32>
    %107 = vector.shape_cast %106 : vector<8xf32> to vector<8x1xf32>
    %cst_42 = arith.constant dense<0.000000e+00> : vector<8xf32>
    %108 = vector.multi_reduction <add>, %101, %cst_42 [1] : vector<8x64xf32> to vector<8xf32>
    %109 = vector.shape_cast %108 : vector<8xf32> to vector<8x1xf32>
    %110 = arith.subf %109, %107 : vector<8x1xf32>
    %c16_i32_43 = arith.constant 16 : i32
    %111 = vector.broadcast %c16_i32_43 : i32 to vector<8x64xi32>
    %112 = arith.cmpi slt, %100, %111 : vector<8x64xi32>
    %cst_44 = arith.constant 9.99999996E-13 : f32
    %113 = vector.broadcast %cst_44 : f32 to vector<8x1xf32>
    %114 = arith.addf %107, %113 : vector<8x1xf32>
    %115 = math.rsqrt %114 : vector<8x1xf32>
    %cst_45 = arith.constant 9.99999996E-13 : f32
    %116 = vector.broadcast %cst_45 : f32 to vector<8x1xf32>
    %117 = arith.addf %110, %116 : vector<8x1xf32>
    %118 = math.rsqrt %117 : vector<8x1xf32>
    %119 = vector.shape_cast %115 : vector<8x1xf32> to vector<8x1xf32>
    %120 = vector.broadcast %119 : vector<8x1xf32> to vector<8x64xf32>
    %121 = vector.shape_cast %118 : vector<8x1xf32> to vector<8x1xf32>
    %122 = vector.broadcast %121 : vector<8x1xf32> to vector<8x64xf32>
    %123 = arith.select %112, %120, %122 : vector<8x64xi1>, vector<8x64xf32>
    %124 = arith.mulf %99, %123 : vector<8x64xf32>
    %c0_46 = arith.constant 0 : index
    %c0_47 = arith.constant 0 : index
    %125 = vector.load %arg3[%c0_46, %c0_47] : memref<8x64xf32, #tpu.memory_space<vmem>>, vector<8x64xf32>
    tpu.vector_store %arg3[%c0_46, %c0_47], %124 {strides = array<i32>} : memref<8x64xf32, #tpu.memory_space<vmem>>, vector<8x64xf32>,
    return
  }
}

</mosaic_0001>

<bundles_post_ra>
// kernel: dssm_forward.1
= control target key start
LH: loop header
LB: loop body
LE: loop exit
PB: predicated region body
PF: predicated region fallthrough
CT: control target
= control target key end

     0   :  { %v488_v0 = vmov 0.0   ;;  %vm489_vm0 = vmmov 0   ;;  %vm49_vm1 = vcmask 523264   ;;  %v118_v36 = vlaneseq  ;;  %s605_s1 = inlined_call_operand.vmem [shape: bf16[3,64,64], index: 1, kind: input, shape index: {}]   ;;  %s606_s0 = inlined_call_operand.vmem [shape: f32[8,64], index: 0, kind: input, shape index: {}]   ;;  %s607_s2 = inlined_call_operand.vmem [shape: f32[3,2,64], index: 2, kind: input, shape index: {}]   ;;  %s608_s3 = inlined_call_operand.vmem [shape: f32[8,64], index: 3, kind: output, shape index: {}]  }
   0x1   :  { %428 = vmatprep.subr.bf16.mxu0 %v488_v0  ;;  %v466_v1 = vld [vmem:[%s605_s1] sm:$0xff]   ;;  %436 = vmatprep.mubr.msk.bf16.mxu0 %vm489_vm0, %v488_v0  ;;  %v467_v2 = vld [vmem:[%s605_s1 + $0x8] sm:$0xff]   ;;  %v468_v3 = vld [vmem:[%s605_s1 + $0x10] sm:$0xff]  }
   0x2   :  { %440 = vmatprep.subr.bf16.mxu1 %v488_v0  ;;  %448 = vmatprep.mubr.msk.bf16.mxu1 %vm489_vm0, %v488_v0  ;;  %v469_v4 = vld [vmem:[%s605_s1 + $0x18] sm:$0xff]   ;;  %v15_v5 = vld [vmem:[%s606_s0] sm:$0xff]  ;;  %v471_v8 = vld [vmem:[%s605_s1 + $0x28] sm:$0xff]   ;;  %v119_v37 = vshrl.u32 %v118_v36, 7 }
   0x3   :  { %429 = vmatpush3.bf16.msra.mxu0 %v466_v1  ;;  %v16_v6 = vpack.c.bf16 %v15_v5, %v15_v5  ;;  %v470_v7 = vld [vmem:[%s605_s1 + $0x20] sm:$0xff]   ;;  %v472_v9 = vld [vmem:[%s605_s1 + $0x30] sm:$0xff]   ;;  %v473_v10 = vld [vmem:[%s605_s1 + $0x38] sm:$0xff]  }
   0x4   :  { %430 = vmatprep.subr.bf16.mxu0 %v488_v0  ;;  %441 = vmatpush3.bf16.msra.mxu1 %v470_v7  ;;  %v113_v38 = vld [vmem:[%s607_s2] sm:$0x3]  ;;  %v559_v39 = vsub.s32 0, %v119_v37  ;;  %v561_v40 = vsub.s32 1, %v119_v37  ;;  %v475_v51 = vld [vmem:[%s605_s1 + $0x48] sm:$0xff]   ;;  %v476_v52 = vld [vmem:[%s605_s1 + $0x50] sm:$0xff]  }
   0x5   :  { %442 = vmatprep.subr.bf16.mxu1 %v488_v0  ;;  %v474_v50 = vld [vmem:[%s605_s1 + $0x40] sm:$0xff]   ;;  %v477_v53 = vld [vmem:[%s605_s1 + $0x58] sm:$0xff]  }
   0x6   :  { %v126_v45 = vrot.slane %v113_v38, %v561_v40 }
   0x7   :  { %431 = vmatpush3.bf16.msra.mxu0 %v467_v2 }
   0x8   :  { %432 = vmatprep.subr.bf16.mxu0 %v488_v0  ;;  %443 = vmatpush3.bf16.msra.mxu1 %v471_v8 }
   0x9   :  { %444 = vmatprep.subr.bf16.mxu1 %v488_v0 }
   0xb   :  { %433 = vmatpush3.bf16.msra.mxu0 %v468_v3 }
   0xc   :  { %434 = vmatprep.subr.bf16.mxu0 %v488_v0  ;;  %445 = vmatpush3.bf16.msra.mxu1 %v472_v9 }
   0xd   :  { %446 = vmatprep.subr.bf16.mxu1 %v488_v0 }
   0xf   :  { %435 = vmatpush3.bf16.msra.mxu0 %v469_v4 }
  0x10   :  { %452 = vmatprep.subr.bf16.mxu0 %v488_v0  ;;  %447 = vmatpush3.bf16.msra.mxu1 %v473_v10 }
  0x12   :  { %437 = vmatmul.mubr.msk.bf16.vlgmr.msra.gmra.mrb[0].mxu0 %vm49_vm1, %v16_v6 }
  0x13   :  { %460 = vmatprep.mubr.msk.bf16.mxu0 %vm489_vm0, %v488_v0  ;;  %453 = vmatpush3.bf16.msra.mxu0 %v474_v50 }
  0x14   :  { %454 = vmatprep.subr.bf16.mxu0 %v488_v0 }
  0x17   :  { %455 = vmatpush3.bf16.msra.mxu0 %v475_v51 }
  0x18   :  { %456 = vmatprep.subr.bf16.mxu0 %v488_v0 }
  0x1b   :  { %457 = vmatpush3.bf16.msra.mxu0 %v476_v52 }
  0x1c   :  { %458 = vmatprep.subr.bf16.mxu0 %v488_v0 }
  0x1f   :  { %459 = vmatpush3.bf16.msra.mxu0 %v477_v53  ;;  %v412_v53 = vld [vmem:[%s607_s2 + $0x4] sm:$0x3] }
  0xe5   :  { %v87_v11 = vpop.f32.mrb[0].mxu0 }
  0xe6   :  { %v93_v12 = vsel %vm49_vm1, %v87_v11, 0.0  ;;  %v101_v13 = vmul.f32 %v87_v11, %v87_v11  ;;  %v438_v14 = vpop.f32.mrb[1].mxu0 }
  0xe7   :  { %v94_v15 = vrot.slane %v93_v12, 4  ;;  %v90_v16 = vpop.f32.mrb[2].mxu0 }
  0xe8   :  { %v102_v17 = vsel %vm49_vm1, %v101_v13, 0.0  ;;  %v439_v18 = vpop.f32.mrb[3].mxu0 }
  0xe9   :  { %v95_v19 = vadd.f32 %v94_v15, %v93_v12  ;;  %v103_v20 = vrot.slane %v102_v17, 4  ;;  %v398_v15 = vld [vmem:[%s607_s2 + $0x2] sm:$0x3] }
  0xeb   :  { %v96_v21 = vrot.slane %v95_v19, 2  ;;  %v104_v22 = vadd.f32 %v103_v20, %v102_v17  ;;  %v240_v20 = vrot.slane %v398_v15, %v561_v40 }
  0xed   :  { %v97_v23 = vadd.f32 %v96_v21, %v95_v19  ;;  %v105_v24 = vrot.slane %v104_v22, 2 }
  0xef   :  { %v98_v25 = vrot.slane %v97_v23, 1  ;;  %v106_v26 = vadd.f32 %v105_v24, %v104_v22 }
  0xf1   :  { %v99_v27 = vadd.f32 %v98_v25, %v97_v23  ;;  %v107_v28 = vrot.slane %v106_v26, 1 }
  0xf3   :  { %v100_v29 = vmul.f32 0.125, %v99_v27  ;;  %v108_v30 = vadd.f32 %v107_v28, %v106_v26 }
  0xf5   :  { %v109_v31 = vmul.f32 0.125, %v108_v30  ;;  %v110_v32 = vmul.f32 %v100_v29, %v100_v29  ;;  %v117_v43 = vsub.f32 %v87_v11, %v100_v29 }
  0xf7   :  { %v111_v33 = vsub.f32 %v109_v31, %v110_v32 }
  0xf9   :  { %v112_v34 = vmax.f32 %v111_v33, 0.0 }
  0xfb   :  { %v114_v35 = vadd.f32 1e-05, %v112_v34 }
  0xfd   :  { %478 = vrsqrt.f32 %v114_v35 }
 0x107   :  { %v479_v41 = vpop.eup %478 }
 0x108   :  { %v116_v42 = vmul.f32 %v479_v41, %v113_v38 }
 0x10a   :  { %v121_v44 = vrot.slane %v116_v42, %v559_v39 }
 0x10c   :  { %v122_v46 = vmul.f32 %v121_v44, %v117_v43 }
 0x10e   :  { %v127_v47 = vadd.f32 %v126_v45, %v122_v46 }
 0x110   :  { %v128_v48 = vmax.f32 %v127_v47, 0.0 }
 0x112   :  { %v129_v49 = vpack.c.bf16 %v128_v48, %v128_v48 }
 0x114   :  { %449 = vmatmul.mubr.msk.bf16.vlgmr.msra.gmra.mrb[0].mxu1 %vm49_vm1, %v129_v49 }
 0x1e7   :  { %v200_v54 = vpop.f32.mrb[0].mxu1 }
 0x1e8   :  { %v206_v55 = vsel %vm49_vm1, %v200_v54, 0.0  ;;  %v214_v56 = vmul.f32 %v200_v54, %v200_v54  ;;  %v450_v57 = vpop.f32.mrb[1].mxu1 }
 0x1e9   :  { %v207_v58 = vrot.slane %v206_v55, 4  ;;  %v203_v59 = vpop.f32.mrb[2].mxu1 }
 0x1ea   :  { %v215_v60 = vsel %vm49_vm1, %v214_v56, 0.0  ;;  %v451_v61 = vpop.f32.mrb[3].mxu1 }
 0x1eb   :  { %v208_v62 = vadd.f32 %v207_v58, %v206_v55  ;;  %v216_v63 = vrot.slane %v215_v60, 4  ;;  %v354_v58 = vrot.slane %v412_v53, %v561_v40 }
 0x1ed   :  { %v209_v1 = vrot.slane %v208_v62, 2  ;;  %v217_v2 = vadd.f32 %v216_v63, %v215_v60  ;;  %v358_v60 = vand.u32 127, %v118_v36 }
 0x1ef   :  { %v210_v0 = vadd.f32 %v209_v1, %v208_v62  ;;  %v218_v3 = vrot.slane %v217_v2, 2  ;;  %vm360_vm2 = vcmp.lt.s32.totalorder %v358_v60, 16 }
 0x1f1   :  { %v211_v4 = vrot.slane %v210_v0, 1  ;;  %v219_v5 = vadd.f32 %v218_v3, %v217_v2 }
 0x1f3   :  { %v212_v6 = vadd.f32 %v211_v4, %v210_v0  ;;  %v220_v7 = vrot.slane %v219_v5, 1 }
 0x1f5   :  { %v213_v8 = vmul.f32 0.125, %v212_v6  ;;  %v221_v9 = vadd.f32 %v220_v7, %v219_v5 }
 0x1f7   :  { %v222_v10 = vmul.f32 0.125, %v221_v9  ;;  %v223_v11 = vmul.f32 %v213_v8, %v213_v8  ;;  %v231_v18 = vsub.f32 %v200_v54, %v213_v8 }
 0x1f9   :  { %v224_v12 = vsub.f32 %v222_v10, %v223_v11 }
 0x1fb   :  { %v225_v13 = vmax.f32 %v224_v12, 0.0 }
 0x1fd   :  { %v228_v14 = vadd.f32 1e-05, %v225_v13 }
 0x1ff   :  { %480 = vrsqrt.f32 %v228_v14 }
 0x209   :  { %v481_v16 = vpop.eup %480 }
 0x20a   :  { %v230_v17 = vmul.f32 %v481_v16, %v398_v15 }
 0x20c   :  { %v235_v19 = vrot.slane %v230_v17, %v559_v39 }
 0x20e   :  { %v236_v21 = vmul.f32 %v235_v19, %v231_v18 }
 0x210   :  { %v241_v22 = vadd.f32 %v240_v20, %v236_v21 }
 0x212   :  { %v242_v23 = vmax.f32 %v241_v22, 0.0 }
 0x214   :  { %v243_v24 = vpack.c.bf16 %v242_v23, %v242_v23 }
 0x216   :  { %461 = vmatmul.mubr.msk.bf16.vlgmr.msra.gmra.mrb[4].mxu0 %vm49_vm1, %v243_v24 }
 0x2e9   :  { %v314_v25 = vpop.f32.mrb[4].mxu0 }
 0x2ea   :  { %v320_v26 = vsel %vm49_vm1, %v314_v25, 0.0  ;;  %v328_v27 = vmul.f32 %v314_v25, %v314_v25  ;;  %v462_v28 = vpop.f32.mrb[5].mxu0 }
 0x2eb   :  { %v321_v29 = vrot.slane %v320_v26, 4  ;;  %v317_v30 = vpop.f32.mrb[6].mxu0 }
 0x2ec   :  { %v329_v31 = vsel %vm49_vm1, %v328_v27, 0.0  ;;  %v463_v32 = vpop.f32.mrb[7].mxu0 }
 0x2ed   :  { %v322_v33 = vadd.f32 %v321_v29, %v320_v26  ;;  %v330_v34 = vrot.slane %v329_v31, 4 }
 0x2ef   :  { %v323_v35 = vrot.slane %v322_v33, 2  ;;  %v331_v37 = vadd.f32 %v330_v34, %v329_v31 }
 0x2f1   :  { %v324_v38 = vadd.f32 %v323_v35, %v322_v33  ;;  %v332_v41 = vrot.slane %v331_v37, 2 }
 0x2f3   :  { %v325_v42 = vrot.slane %v324_v38, 1  ;;  %v333_v43 = vadd.f32 %v332_v41, %v331_v37 }
 0x2f5   :  { %v326_v44 = vadd.f32 %v325_v42, %v324_v38  ;;  %v334_v45 = vrot.slane %v333_v43, 1 }
 0x2f7   :  { %v327_v46 = vmul.f32 0.125, %v326_v44  ;;  %v335_v47 = vadd.f32 %v334_v45, %v333_v43 }
 0x2f9   :  { %v336_v48 = vmul.f32 0.125, %v335_v47  ;;  %v337_v49 = vmul.f32 %v327_v46, %v327_v46  ;;  %v345_v56 = vsub.f32 %v314_v25, %v327_v46 }
 0x2fb   :  { %v338_v50 = vsub.f32 %v336_v48, %v337_v49 }
 0x2fd   :  { %v339_v51 = vmax.f32 %v338_v50, 0.0 }
 0x2ff   :  { %v342_v52 = vadd.f32 1e-05, %v339_v51 }
 0x301   :  { %482 = vrsqrt.f32 %v342_v52 }
 0x30b   :  { %v483_v54 = vpop.eup %482 }
 0x30c   :  { %v344_v55 = vmul.f32 %v483_v54, %v412_v53 }
 0x30e   :  { %v349_v57 = vrot.slane %v344_v55, %v559_v39 }
 0x310   :  { %v350_v59 = vmul.f32 %v349_v57, %v345_v56 }
 0x312   :  { %v355_v61 = vadd.f32 %v354_v58, %v350_v59 }
 0x314   :  { %v356_v62 = vmax.f32 %v355_v61, 0.0 }
 0x316   :  { %v359_v63 = vmul.f32 %v356_v62, %v356_v62 }
 0x318   :  { %v361_v1 = vsel %vm360_vm2, %v359_v63, 0.0  ;;  %v365_v0 = vsel %vm49_vm1, %v359_v63, 0.0 }
 0x319   :  { %v362_v2 = vsel %vm49_vm1, %v361_v1, 0.0 }
 0x31a   :  { %363 = vadd.xlane.f32.xlu0 %v362_v2 }
 0x31e   :  { %366 = vadd.xlane.f32.xlu0 %v365_v0 }
 0x3a7   :  { %v364_v3 = vpop.xlane.xlu0 %363 }
 0x3a8   :  { %v369_v4 = vadd.f32 1e-12, %v364_v3 }
 0x3aa   :  { %484 = vrsqrt.f32 %v369_v4 }
 0x3ab   :  { %v367_v39 = vpop.xlane.xlu0 %366 }
 0x3ac   :  { %v368_v5 = vsub.f32 %v367_v39, %v364_v3 }
 0x3ae   :  { %v371_v40 = vadd.f32 1e-12, %v368_v5 }
 0x3b0   :  { %486 = vrsqrt.f32 %v371_v40 }
 0x3b4   :  { %v485_v36 = vpop.eup %484 }
 0x3ba   :  { %v487_v6 = vpop.eup %486 }
 0x3bb   :  { %v373_v7 = vsel %vm360_vm2, %v485_v36, %v487_v6 }
 0x3bc   :  { %v374_v8 = vmul.f32 %v373_v7, %v356_v62 }
 0x3be   :  { %375 = vst.msk [vmem:[%s608_s3] sm:$0xff] %vm49_vm1, %v374_v8 }

</bundles_post_ra>
